<compile_context>
chip_gen: v5e
topology: v5e:2x2
jax: 0.10.0
libtpu: 0.0.40
codegen_flags: <defaults>
</compile_context>

<pallas_src>
import functools

import jax
import jax.numpy as jnp
from jax import lax
from jax.experimental import pallas as pl
from jax.experimental.pallas import tpu as pltpu

EPS = 1e-5  # nn.BatchNorm2d default eps


def _stage_taps(x_ref, stage_ref, *, ipc, cin, m_pad, deltas):
    """In-VMEM im2col: stage[t*Cin+ci, i*M_pad+m] = x[i, ci, m + delta_t] (all offsets static)."""
    for i in range(ipc):
        for t, d in enumerate(deltas):
            stage_ref[t * cin:(t + 1) * cin, i * m_pad:(i + 1) * m_pad] = \
                x_ref[i, :, d:d + m_pad]


def stats_kernel(x_ref, w_ref, mask_ref, sum_ref, sq_ref, stage_ref, *,
                 ipc, cin, m_pad, deltas):
    # Pass 1: per-channel sum / sum-of-squares of the conv output (BatchNorm training stats).
    @pl.when(pl.program_id(1) == 0)
    def _init():
        sum_ref[...] = jnp.zeros_like(sum_ref)
        sq_ref[...] = jnp.zeros_like(sq_ref)

    _stage_taps(x_ref, stage_ref, ipc=ipc, cin=cin, m_pad=m_pad, deltas=deltas)
    hid = jnp.dot(w_ref[...], stage_ref[...],
                  preferred_element_type=jnp.float32)          # (Cout, ipc*M_pad) f32
    hm = hid * mask_ref[...]                                   # zero padded rows / columns
    sum_ref[...] += jnp.sum(hm, axis=1, keepdims=True)         # (Cout, 1)
    sq_ref[...] += jnp.sum(hm * hid, axis=1, keepdims=True)


def apply_kernel(x_ref, w_ref, scale_ref, shift_ref, out_ref, stage_ref, *,
                 ipc, cin, cout, m_pad, deltas):
    # Pass 2: conv (recomputed) -> BN scale/shift -> ReLU, plus fused identity branch
    # (identity weight is packed as extra output rows of the same matmul).
    _stage_taps(x_ref, stage_ref, ipc=ipc, cin=cin, m_pad=m_pad, deltas=deltas)
    acc = jnp.dot(w_ref[...], stage_ref[...],
                  preferred_element_type=jnp.float32)          # (2*Cout, ipc*M_pad) f32
    hid = jnp.maximum(acc[:cout] * scale_ref[...] + shift_ref[...], 0.0) + acc[cout:]
    for i in range(ipc):                                        # lane-aligned full-width stores
        out_ref[i] = hid[:, i * m_pad:(i + 1) * m_pad]
    # TODO(synk): optional bf16 output writeback (halves output bytes) if the consumer tolerates it.


def tresblock1_forward(x_nchw, wT, b, gamma, beta, w1, kernel_size=3, stride=1):
    # TODO(synk): stride > 1 (true bilinear-upsampling identity path) not implemented; module default stride=1.
    assert stride == 1
    N, Cin, H, W = x_nchw.shape
    Cout = wT.shape[1]
    k = kernel_size
    assert k % 2 == 1, "odd kernel_size assumed (size-preserving ConvTranspose2d)"
    p = (k - stride) // 2
    Wp = W + 2 * p
    KP = k * k * Cin

    # Per image: compute M_pad flattened output pixels (h*Wp + w), padded to a multiple of 128
    # so the matmul N dim / output stores are lane-dense. Extra pixels are garbage (masked /
    # sliced away). The per-image input block is padded so every tap slice stays in bounds.
    M_pad = ((H * Wp + 127) // 128) * 128
    max_delta = 2 * p * Wp + 2 * p
    rows_blk = max(H + 2 * p, -(-(M_pad + max_delta) // Wp))
    S_blk = rows_blk * Wp
    assert M_pad + max_delta <= S_blk

    # Single padded copy of x (bf16 MXU stream); reshape to flattened pixels is free.
    x_bf = jnp.pad(x_nchw.astype(jnp.bfloat16),
                   ((0, 0), (0, 0), (p, rows_blk - H - p), (p, p)))     # (N, Cin, rows_blk, Wp)
    xf = x_bf.reshape(N, Cin, S_blk)

    # Images per grid step from a VMEM budget (~2 MiB input block), divisor of N, unroll-capped.
    bytes_per_img = Cin * S_blk * 2
    ipc_cap = int(max(1, min(8, (2 << 20) // max(1, bytes_per_img))))
    ipc = 1
    for d in range(1, N + 1):
        if N % d == 0 and d <= ipc_cap:
            ipc = d
    n_chunks = N // ipc
    NC = 2 if (n_chunks >= 2 and n_chunks % 2 == 0) else 1   # per-TensorCore stats partials (v7x)
    CPC = n_chunks // NC

    # ConvTranspose2d(stride=1) == correlation with the flipped kernel:
    #   w_mat[co, t*Cin + ci] = wT[ci, co, k-1-kh, k-1-kw],  t = kh*k + kw
    w_flip = wT[:, :, ::-1, ::-1]
    w_mat = jnp.transpose(w_flip, (1, 2, 3, 0)).reshape(Cout, KP).astype(jnp.float32)
    # Identity branch (UpsamplingBilinear2d(scale=1) -> 1x1 conv, no bias) == center tap only;
    # fused as extra output rows so one MXU pass yields both branches.
    w_id = jnp.zeros((Cout, k * k, Cin), jnp.float32).at[:, p * k + p, :].set(
        w1[:, :, 0, 0].astype(jnp.float32)).reshape(Cout, KP)
    w_stats = w_mat.astype(jnp.bfloat16)                                    # (Cout, KP)
    w_apply = jnp.concatenate([w_mat, w_id], axis=0).astype(jnp.bfloat16)   # (2*Cout, KP)
    # NOTE: ConvTranspose2d bias `b` is cancelled exactly by training-mode BatchNorm
    # (it only shifts the per-channel mean), so it is intentionally unused.

    deltas = tuple(kh * Wp + kw for kh in range(k) for kw in range(k))
    m_idx = jnp.arange(M_pad)
    mask1 = (((m_idx // Wp) < H) & ((m_idx % Wp) < W)).astype(jnp.float32)
    mask = jnp.tile(mask1, ipc).reshape(1, ipc * M_pad)

    x_spec_stats = pl.BlockSpec((ipc, Cin, S_blk), lambda c, i: (c * CPC + i, 0, 0))
    x_spec_apply = pl.BlockSpec((ipc, Cin, S_blk), lambda c: (c, 0, 0))

    est = (2 * ipc * Cin * S_blk * 2 + 2 * 2 * Cout * KP * 2 + 2 * ipc * M_pad * 4
           + KP * ipc * M_pad * 2 + 2 * ipc * Cout * M_pad * 4 + 4096)
    # Cap well below v7x's 64 MiB/TC physical VMEM (also fine for v5e/v6e's 128 MiB).
    vmem_limit = int(min(40 << 20, max(16 << 20, 6 * est)))

    # ---- pass 1: BatchNorm training statistics (per-core partial accumulators) ----
    sum_p, sq_p = pl.pallas_call(
        functools.partial(stats_kernel, ipc=ipc, cin=Cin, m_pad=M_pad, deltas=deltas),
        out_shape=(jax.ShapeDtypeStruct((NC, Cout, 1), jnp.float32),
                   jax.ShapeDtypeStruct((NC, Cout, 1), jnp.float32)),
        grid=(NC, CPC),
        in_specs=[x_spec_stats,
                  pl.BlockSpec((Cout, KP), lambda c, i: (0, 0)),
                  pl.BlockSpec((1, ipc * M_pad), lambda c, i: (0, 0))],
        out_specs=(pl.BlockSpec((None, Cout, 1), lambda c, i: (c, 0, 0)),
                   pl.BlockSpec((None, Cout, 1), lambda c, i: (c, 0, 0))),
        scratch_shapes=[pltpu.VMEM((KP, ipc * M_pad), jnp.bfloat16)],
        compiler_params=pltpu.CompilerParams(
            dimension_semantics=("parallel", "arbitrary"),
            vmem_limit_bytes=vmem_limit),
    )(xf, w_stats, mask)

    count = float(N * H * W)
    sum_c = jnp.sum(sum_p, axis=0)                         # (Cout, 1)
    sq_c = jnp.sum(sq_p, axis=0)
    mean = sum_c / count
    # TODO(synk): E[x^2]-E[x]^2 can cancel for large/biased activations; use a Welford-style merge if needed.
    var = jnp.maximum(sq_c / count - mean * mean, 0.0)     # biased variance (BN training normalization)
    scale = gamma.astype(jnp.float32).reshape(Cout, 1) * lax.rsqrt(var + EPS)
    shift = beta.astype(jnp.float32).reshape(Cout, 1) - mean * scale
    # TODO(synk): BatchNorm running_mean/running_var buffer updates (training side effect) are not emitted.

    # ---- pass 2: conv -> scale/shift -> ReLU + identity, fully parallel across chunks / TCs ----
    out_full = pl.pallas_call(
        functools.partial(apply_kernel, ipc=ipc, cin=Cin, cout=Cout, m_pad=M_pad, deltas=deltas),
        out_shape=jax.ShapeDtypeStruct((N, Cout, M_pad), jnp.float32),
        grid=(n_chunks,),
        in_specs=[x_spec_apply,
                  pl.BlockSpec((2 * Cout, KP), lambda c: (0, 0)),
                  pl.BlockSpec((Cout, 1), lambda c: (0, 0)),
                  pl.BlockSpec((Cout, 1), lambda c: (0, 0))],
        out_specs=pl.BlockSpec((ipc, Cout, M_pad), lambda c: (c, 0, 0)),
        scratch_shapes=[pltpu.VMEM((KP, ipc * M_pad), jnp.bfloat16)],
        compiler_params=pltpu.CompilerParams(
            dimension_semantics=("parallel",),
            vmem_limit_bytes=vmem_limit),
    )(xf, w_apply, scale, shift)

    # (N, Cout, M_pad) -> NCHW: drop pad rows/cols; no transpose needed.
    out = out_full[:, :, :H * Wp].reshape(N, Cout, H, Wp)[:, :, :, :W]
    return out


def reference(x, wT, b, gamma, beta, w1):
    # Pure-JAX reference of the PyTorch forward (training-mode BatchNorm), f32 math.
    w_conv = jnp.transpose(wT[:, :, ::-1, ::-1], (1, 0, 2, 3))          # (Cout, Cin, k, k)
    hid = lax.conv_general_dilated(x, w_conv, (1, 1), 'SAME',
                                   dimension_numbers=('NCHW', 'OIHW', 'NCHW'),
                                   precision=lax.Precision.HIGHEST)
    hid = hid + b[None, :, None, None]
    mean = hid.mean(axis=(0, 2, 3), keepdims=True)
    var = ((hid - mean) ** 2).mean(axis=(0, 2, 3), keepdims=True)
    hid = (gamma[None, :, None, None] * (hid - mean) * lax.rsqrt(var + EPS)
           + beta[None, :, None, None])
    hid = jnp.maximum(hid, 0.0)
    ident = lax.conv_general_dilated(x, w1, (1, 1), 'SAME',
                                     dimension_numbers=('NCHW', 'OIHW', 'NCHW'),
                                     precision=lax.Precision.HIGHEST)
    return hid + ident


if __name__ == "__main__":
    key = jax.random.PRNGKey(0)
    N, Cin, Cout, H, W, k = 2, 4, 8, 16, 16, 3
    ks = jax.random.split(key, 6)
    x = jax.random.normal(ks[0], (N, Cin, H, W), jnp.float32)
    # deterministic synthetic parameters (shapes follow nn.ConvTranspose2d / BatchNorm2d / 1x1 Conv2d)
    wT = 0.1 * jax.random.normal(ks[1], (Cin, Cout, k, k), jnp.float32)   # ConvTranspose2d.weight
    b = 0.1 * jax.random.normal(ks[2], (Cout,), jnp.float32)              # ConvTranspose2d.bias
    gamma = 1.0 + 0.1 * jax.random.normal(ks[3], (Cout,), jnp.float32)    # BatchNorm2d.weight
    beta = 0.1 * jax.random.normal(ks[4], (Cout,), jnp.float32)           # BatchNorm2d.bias
    w1 = 0.1 * jax.random.normal(ks[5], (Cout, Cin, 1, 1), jnp.float32)   # 1x1 Conv2d.weight

    out = tresblock1_forward(x, wT, b, gamma, beta, w1, kernel_size=k, stride=1)
    out = jax.block_until_ready(out)
    assert out.shape == (N, Cout, H, W), out.shape

    # Tight check: the kernel deliberately feeds the MXU bf16 operands (f32 accumulation), so
    # compare against an f32 reference fed the same bf16-rounded x / conv weights.
    rd = lambda a: a.astype(jnp.bfloat16).astype(jnp.float32)
    ref_bf = reference(rd(x), rd(wT), b, gamma, beta, rd(w1))
    err_bf = float(jnp.max(jnp.abs(out - ref_bf)))
    assert jnp.allclose(out, ref_bf, atol=2e-3, rtol=2e-3), f"max abs err vs bf16-rounded ref {err_bf}"

    # Loose sanity check against the pure-f32 reference (gap bounded by bf16 input rounding).
    ref_f32 = reference(x, wT, b, gamma, beta, w1)
    err_f32 = float(jnp.max(jnp.abs(out - ref_f32)))
    assert err_f32 < 0.25, f"max abs err vs f32 ref {err_f32}"

    print("KERNEL_OK")
</pallas_src>

<mosaic_0001>
module attributes {stable_mosaic.version = 11 : i64} {
  func.func @stats_kernel(%arg0: i32, %arg1: i32, %arg2: memref<2x4x432xbf16, #tpu.memory_space<vmem>>, %arg3: memref<8x36xbf16, #tpu.memory_space<vmem>>, %arg4: memref<1x768xf32, #tpu.memory_space<vmem>>, %arg5: memref<1x8x1xf32, #tpu.memory_space<vmem>>, %arg6: memref<1x8x1xf32, #tpu.memory_space<vmem>>, %arg7: memref<36x768xbf16, #tpu.memory_space<vmem>>) attributes {dimension_semantics = [#tpu.dimension_semantics<parallel>, #tpu.dimension_semantics<arbitrary>], iteration_bounds = array<i64: 1, 1>, scalar_prefetch = 0 : i64, scratch_operands = 1 : i64, tpu.core_type = #tpu.core_type<tc>, window_params = [{transform_indices = @transform_0, window_bounds = array<i64: 2, 4, 432>}, {pipeline_mode = #tpu.pipeline_mode<synchronous>, transform_indices = @transform_1, window_bounds = array<i64: 8, 36>}, {pipeline_mode = #tpu.pipeline_mode<synchronous>, transform_indices = @transform_2, window_bounds = array<i64: 1, 768>}, {transform_indices = @transform_3, window_bounds = array<i64: 1, 8, 1>}, {transform_indices = @transform_4, window_bounds = array<i64: 1, 8, 1>}]} {
    %c0_i32 = arith.constant 0 : i32
    %0 = arith.cmpi eq, %arg1, %c0_i32 : i32
    %1 = arith.extui %0 : i1 to i32
    %c0_i32_0 = arith.constant 0 : i32
    %2 = arith.cmpi ne, %1, %c0_i32_0 : i32
    scf.if %2 {
      %cst_94 = arith.constant 0.000000e+00 : f32
      %80 = vector.broadcast %cst_94 : f32 to vector<8x1xf32>
      %c0_95 = arith.constant 0 : index
      %c0_96 = arith.constant 0 : index
      %c0_97 = arith.constant 0 : index
      %81 = vector.load %arg5[%c0_95, %c0_96, %c0_97] : memref<1x8x1xf32, #tpu.memory_space<vmem>>, vector<1x8x1xf32>
      %82 = vector.shape_cast %81 : vector<1x8x1xf32> to vector<8x1xf32>
      %83 = vector.shape_cast %80 : vector<8x1xf32> to vector<1x8x1xf32>
      tpu.vector_store %arg5[%c0_95, %c0_96, %c0_97], %83 {strides = array<i32>} : memref<1x8x1xf32, #tpu.memory_space<vmem>>, vector<1x8x1xf32>,
      %cst_98 = arith.constant 0.000000e+00 : f32
      %84 = vector.broadcast %cst_98 : f32 to vector<8x1xf32>
      %c0_99 = arith.constant 0 : index
      %c0_100 = arith.constant 0 : index
      %c0_101 = arith.constant 0 : index
      %85 = vector.load %arg6[%c0_99, %c0_100, %c0_101] : memref<1x8x1xf32, #tpu.memory_space<vmem>>, vector<1x8x1xf32>
      %86 = vector.shape_cast %85 : vector<1x8x1xf32> to vector<8x1xf32>
      %87 = vector.shape_cast %84 : vector<8x1xf32> to vector<1x8x1xf32>
      tpu.vector_store %arg6[%c0_99, %c0_100, %c0_101], %87 {strides = array<i32>} : memref<1x8x1xf32, #tpu.memory_space<vmem>>, vector<1x8x1xf32>,
    } else {
    }
    %c0 = arith.constant 0 : index
    %c0_1 = arith.constant 0 : index
    %c0_2 = arith.constant 0 : index
    %3 = vector.load %arg2[%c0, %c0_1, %c0_2] : memref<2x4x432xbf16, #tpu.memory_space<vmem>>, vector<1x4x384xbf16>
    %4 = vector.shape_cast %3 : vector<1x4x384xbf16> to vector<4x384xbf16>
    %c0_3 = arith.constant 0 : index
    %c0_4 = arith.constant 0 : index
    %5 = vector.load %arg7[%c0_3, %c0_4] : memref<36x768xbf16, #tpu.memory_space<vmem>>, vector<4x384xbf16>
    tpu.vector_store %arg7[%c0_3, %c0_4], %4 {strides = array<i32>} : memref<36x768xbf16, #tpu.memory_space<vmem>>, vector<4x384xbf16>,
    %c0_5 = arith.constant 0 : index
    %c0_6 = arith.constant 0 : index
    %c1 = arith.constant 1 : index
    %6 = vector.load %arg2[%c0_5, %c0_6, %c1] : memref<2x4x432xbf16, #tpu.memory_space<vmem>>, vector<1x4x384xbf16>
    %7 = vector.shape_cast %6 : vector<1x4x384xbf16> to vector<4x384xbf16>
    %c4 = arith.constant 4 : index
    %c0_7 = arith.constant 0 : index
    %8 = vector.load %arg7[%c4, %c0_7] : memref<36x768xbf16, #tpu.memory_space<vmem>>, vector<4x384xbf16>
    tpu.vector_store %arg7[%c4, %c0_7], %7 {strides = array<i32>} : memref<36x768xbf16, #tpu.memory_space<vmem>>, vector<4x384xbf16>,
    %c0_8 = arith.constant 0 : index
    %c0_9 = arith.constant 0 : index
    %c2 = arith.constant 2 : index
    %9 = vector.load %arg2[%c0_8, %c0_9, %c2] : memref<2x4x432xbf16, #tpu.memory_space<vmem>>, vector<1x4x384xbf16>
    %10 = vector.shape_cast %9 : vector<1x4x384xbf16> to vector<4x384xbf16>
    %c8 = arith.constant 8 : index
    %c0_10 = arith.constant 0 : index
    %11 = vector.load %arg7[%c8, %c0_10] : memref<36x768xbf16, #tpu.memory_space<vmem>>, vector<4x384xbf16>
    tpu.vector_store %arg7[%c8, %c0_10], %10 {strides = array<i32>} : memref<36x768xbf16, #tpu.memory_space<vmem>>, vector<4x384xbf16>,
    %c0_11 = arith.constant 0 : index
    %c0_12 = arith.constant 0 : index
    %c18 = arith.constant 18 : index
    %12 = vector.load %arg2[%c0_11, %c0_12, %c18] : memref<2x4x432xbf16, #tpu.memory_space<vmem>>, vector<1x4x384xbf16>
    %13 = vector.shape_cast %12 : vector<1x4x384xbf16> to vector<4x384xbf16>
    %c12 = arith.constant 12 : index
    %c0_13 = arith.constant 0 : index
    %14 = vector.load %arg7[%c12, %c0_13] : memref<36x768xbf16, #tpu.memory_space<vmem>>, vector<4x384xbf16>
    tpu.vector_store %arg7[%c12, %c0_13], %13 {strides = array<i32>} : memref<36x768xbf16, #tpu.memory_space<vmem>>, vector<4x384xbf16>,
    %c0_14 = arith.constant 0 : index
    %c0_15 = arith.constant 0 : index
    %c19 = arith.constant 19 : index
    %15 = vector.load %arg2[%c0_14, %c0_15, %c19] : memref<2x4x432xbf16, #tpu.memory_space<vmem>>, vector<1x4x384xbf16>
    %16 = vector.shape_cast %15 : vector<1x4x384xbf16> to vector<4x384xbf16>
    %c16 = arith.constant 16 : index
    %c0_16 = arith.constant 0 : index
    %17 = vector.load %arg7[%c16, %c0_16] : memref<36x768xbf16, #tpu.memory_space<vmem>>, vector<4x384xbf16>
    tpu.vector_store %arg7[%c16, %c0_16], %16 {strides = array<i32>} : memref<36x768xbf16, #tpu.memory_space<vmem>>, vector<4x384xbf16>,
    %c0_17 = arith.constant 0 : index
    %c0_18 = arith.constant 0 : index
    %c20 = arith.constant 20 : index
    %18 = vector.load %arg2[%c0_17, %c0_18, %c20] : memref<2x4x432xbf16, #tpu.memory_space<vmem>>, vector<1x4x384xbf16>
    %19 = vector.shape_cast %18 : vector<1x4x384xbf16> to vector<4x384xbf16>
    %c20_19 = arith.constant 20 : index
    %c0_20 = arith.constant 0 : index
    %20 = vector.load %arg7[%c20_19, %c0_20] : memref<36x768xbf16, #tpu.memory_space<vmem>>, vector<4x384xbf16>
    tpu.vector_store %arg7[%c20_19, %c0_20], %19 {strides = array<i32>} : memref<36x768xbf16, #tpu.memory_space<vmem>>, vector<4x384xbf16>,
    %c0_21 = arith.constant 0 : index
    %c0_22 = arith.constant 0 : index
    %c36 = arith.constant 36 : index
    %21 = vector.load %arg2[%c0_21, %c0_22, %c36] : memref<2x4x432xbf16, #tpu.memory_space<vmem>>, vector<1x4x384xbf16>
    %22 = vector.shape_cast %21 : vector<1x4x384xbf16> to vector<4x384xbf16>
    %c24 = arith.constant 24 : index
    %c0_23 = arith.constant 0 : index
    %23 = vector.load %arg7[%c24, %c0_23] : memref<36x768xbf16, #tpu.memory_space<vmem>>, vector<4x384xbf16>
    tpu.vector_store %arg7[%c24, %c0_23], %22 {strides = array<i32>} : memref<36x768xbf16, #tpu.memory_space<vmem>>, vector<4x384xbf16>,
    %c0_24 = arith.constant 0 : index
    %c0_25 = arith.constant 0 : index
    %c37 = arith.constant 37 : index
    %24 = vector.load %arg2[%c0_24, %c0_25, %c37] : memref<2x4x432xbf16, #tpu.memory_space<vmem>>, vector<1x4x384xbf16>
    %25 = vector.shape_cast %24 : vector<1x4x384xbf16> to vector<4x384xbf16>
    %c28 = arith.constant 28 : index
    %c0_26 = arith.constant 0 : index
    %26 = vector.load %arg7[%c28, %c0_26] : memref<36x768xbf16, #tpu.memory_space<vmem>>, vector<4x384xbf16>
    tpu.vector_store %arg7[%c28, %c0_26], %25 {strides = array<i32>} : memref<36x768xbf16, #tpu.memory_space<vmem>>, vector<4x384xbf16>,
    %c0_27 = arith.constant 0 : index
    %c0_28 = arith.constant 0 : index
    %c38 = arith.constant 38 : index
    %27 = vector.load %arg2[%c0_27, %c0_28, %c38] : memref<2x4x432xbf16, #tpu.memory_space<vmem>>, vector<1x4x384xbf16>
    %28 = vector.shape_cast %27 : vector<1x4x384xbf16> to vector<4x384xbf16>
    %c32 = arith.constant 32 : index
    %c0_29 = arith.constant 0 : index
    %29 = vector.load %arg7[%c32, %c0_29] : memref<36x768xbf16, #tpu.memory_space<vmem>>, vector<4x384xbf16>
    tpu.vector_store %arg7[%c32, %c0_29], %28 {strides = array<i32>} : memref<36x768xbf16, #tpu.memory_space<vmem>>, vector<4x384xbf16>,
    %c1_30 = arith.constant 1 : index
    %c0_31 = arith.constant 0 : index
    %c0_32 = arith.constant 0 : index
    %30 = vector.load %arg2[%c1_30, %c0_31, %c0_32] : memref<2x4x432xbf16, #tpu.memory_space<vmem>>, vector<1x4x384xbf16>
    %31 = vector.shape_cast %30 : vector<1x4x384xbf16> to vector<4x384xbf16>
    %c0_33 = arith.constant 0 : index
    %c384 = arith.constant 384 : index
    %32 = vector.load %arg7[%c0_33, %c384] : memref<36x768xbf16, #tpu.memory_space<vmem>>, vector<4x384xbf16>
    tpu.vector_store %arg7[%c0_33, %c384], %31 {strides = array<i32>} : memref<36x768xbf16, #tpu.memory_space<vmem>>, vector<4x384xbf16>,
    %c1_34 = arith.constant 1 : index
    %c0_35 = arith.constant 0 : index
    %c1_36 = arith.constant 1 : index
    %33 = vector.load %arg2[%c1_34, %c0_35, %c1_36] : memref<2x4x432xbf16, #tpu.memory_space<vmem>>, vector<1x4x384xbf16>
    %34 = vector.shape_cast %33 : vector<1x4x384xbf16> to vector<4x384xbf16>
    %c4_37 = arith.constant 4 : index
    %c384_38 = arith.constant 384 : index
    %35 = vector.load %arg7[%c4_37, %c384_38] : memref<36x768xbf16, #tpu.memory_space<vmem>>, vector<4x384xbf16>
    tpu.vector_store %arg7[%c4_37, %c384_38], %34 {strides = array<i32>} : memref<36x768xbf16, #tpu.memory_space<vmem>>, vector<4x384xbf16>,
    %c1_39 = arith.constant 1 : index
    %c0_40 = arith.constant 0 : index
    %c2_41 = arith.constant 2 : index
    %36 = vector.load %arg2[%c1_39, %c0_40, %c2_41] : memref<2x4x432xbf16, #tpu.memory_space<vmem>>, vector<1x4x384xbf16>
    %37 = vector.shape_cast %36 : vector<1x4x384xbf16> to vector<4x384xbf16>
    %c8_42 = arith.constant 8 : index
    %c384_43 = arith.constant 384 : index
    %38 = vector.load %arg7[%c8_42, %c384_43] : memref<36x768xbf16, #tpu.memory_space<vmem>>, vector<4x384xbf16>
    tpu.vector_store %arg7[%c8_42, %c384_43], %37 {strides = array<i32>} : memref<36x768xbf16, #tpu.memory_space<vmem>>, vector<4x384xbf16>,
    %c1_44 = arith.constant 1 : index
    %c0_45 = arith.constant 0 : index
    %c18_46 = arith.constant 18 : index
    %39 = vector.load %arg2[%c1_44, %c0_45, %c18_46] : memref<2x4x432xbf16, #tpu.memory_space<vmem>>, vector<1x4x384xbf16>
    %40 = vector.shape_cast %39 : vector<1x4x384xbf16> to vector<4x384xbf16>
    %c12_47 = arith.constant 12 : index
    %c384_48 = arith.constant 384 : index
    %41 = vector.load %arg7[%c12_47, %c384_48] : memref<36x768xbf16, #tpu.memory_space<vmem>>, vector<4x384xbf16>
    tpu.vector_store %arg7[%c12_47, %c384_48], %40 {strides = array<i32>} : memref<36x768xbf16, #tpu.memory_space<vmem>>, vector<4x384xbf16>,
    %c1_49 = arith.constant 1 : index
    %c0_50 = arith.constant 0 : index
    %c19_51 = arith.constant 19 : index
    %42 = vector.load %arg2[%c1_49, %c0_50, %c19_51] : memref<2x4x432xbf16, #tpu.memory_space<vmem>>, vector<1x4x384xbf16>
    %43 = vector.shape_cast %42 : vector<1x4x384xbf16> to vector<4x384xbf16>
    %c16_52 = arith.constant 16 : index
    %c384_53 = arith.constant 384 : index
    %44 = vector.load %arg7[%c16_52, %c384_53] : memref<36x768xbf16, #tpu.memory_space<vmem>>, vector<4x384xbf16>
    tpu.vector_store %arg7[%c16_52, %c384_53], %43 {strides = array<i32>} : memref<36x768xbf16, #tpu.memory_space<vmem>>, vector<4x384xbf16>,
    %c1_54 = arith.constant 1 : index
    %c0_55 = arith.constant 0 : index
    %c20_56 = arith.constant 20 : index
    %45 = vector.load %arg2[%c1_54, %c0_55, %c20_56] : memref<2x4x432xbf16, #tpu.memory_space<vmem>>, vector<1x4x384xbf16>
    %46 = vector.shape_cast %45 : vector<1x4x384xbf16> to vector<4x384xbf16>
    %c20_57 = arith.constant 20 : index
    %c384_58 = arith.constant 384 : index
    %47 = vector.load %arg7[%c20_57, %c384_58] : memref<36x768xbf16, #tpu.memory_space<vmem>>, vector<4x384xbf16>
    tpu.vector_store %arg7[%c20_57, %c384_58], %46 {strides = array<i32>} : memref<36x768xbf16, #tpu.memory_space<vmem>>, vector<4x384xbf16>,
    %c1_59 = arith.constant 1 : index
    %c0_60 = arith.constant 0 : index
    %c36_61 = arith.constant 36 : index
    %48 = vector.load %arg2[%c1_59, %c0_60, %c36_61] : memref<2x4x432xbf16, #tpu.memory_space<vmem>>, vector<1x4x384xbf16>
    %49 = vector.shape_cast %48 : vector<1x4x384xbf16> to vector<4x384xbf16>
    %c24_62 = arith.constant 24 : index
    %c384_63 = arith.constant 384 : index
    %50 = vector.load %arg7[%c24_62, %c384_63] : memref<36x768xbf16, #tpu.memory_space<vmem>>, vector<4x384xbf16>
    tpu.vector_store %arg7[%c24_62, %c384_63], %49 {strides = array<i32>} : memref<36x768xbf16, #tpu.memory_space<vmem>>, vector<4x384xbf16>,
    %c1_64 = arith.constant 1 : index
    %c0_65 = arith.constant 0 : index
    %c37_66 = arith.constant 37 : index
    %51 = vector.load %arg2[%c1_64, %c0_65, %c37_66] : memref<2x4x432xbf16, #tpu.memory_space<vmem>>, vector<1x4x384xbf16>
    %52 = vector.shape_cast %51 : vector<1x4x384xbf16> to vector<4x384xbf16>
    %c28_67 = arith.constant 28 : index
    %c384_68 = arith.constant 384 : index
    %53 = vector.load %arg7[%c28_67, %c384_68] : memref<36x768xbf16, #tpu.memory_space<vmem>>, vector<4x384xbf16>
    tpu.vector_store %arg7[%c28_67, %c384_68], %52 {strides = array<i32>} : memref<36x768xbf16, #tpu.memory_space<vmem>>, vector<4x384xbf16>,
    %c1_69 = arith.constant 1 : index
    %c0_70 = arith.constant 0 : index
    %c38_71 = arith.constant 38 : index
    %54 = vector.load %arg2[%c1_69, %c0_70, %c38_71] : memref<2x4x432xbf16, #tpu.memory_space<vmem>>, vector<1x4x384xbf16>
    %55 = vector.shape_cast %54 : vector<1x4x384xbf16> to vector<4x384xbf16>
    %c32_72 = arith.constant 32 : index
    %c384_73 = arith.constant 384 : index
    %56 = vector.load %arg7[%c32_72, %c384_73] : memref<36x768xbf16, #tpu.memory_space<vmem>>, vector<4x384xbf16>
    tpu.vector_store %arg7[%c32_72, %c384_73], %55 {strides = array<i32>} : memref<36x768xbf16, #tpu.memory_space<vmem>>, vector<4x384xbf16>,
    %c0_74 = arith.constant 0 : index
    %c0_75 = arith.constant 0 : index
    %57 = vector.load %arg3[%c0_74, %c0_75] : memref<8x36xbf16, #tpu.memory_space<vmem>>, vector<8x36xbf16>
    %c0_76 = arith.constant 0 : index
    %c0_77 = arith.constant 0 : index
    %58 = vector.load %arg7[%c0_76, %c0_77] : memref<36x768xbf16, #tpu.memory_space<vmem>>, vector<36x768xbf16>
    %cst = arith.constant dense<0.000000e+00> : vector<8x768xf32>
    %59 = tpu.matmul %57, %58, %cst {dimension_numbers = #tpu.dot_dimension_numbers<[1], [0], [0], [1], [0, 0, 1, 1], [], []>} : vector<8x36xbf16>, vector<36x768xbf16>, vector<8x768xf32> -> vector<8x768xf32>
    %c0_78 = arith.constant 0 : index
    %c0_79 = arith.constant 0 : index
    %60 = vector.load %arg4[%c0_78, %c0_79] : memref<1x768xf32, #tpu.memory_space<vmem>>, vector<1x768xf32>
    %61 = vector.broadcast %60 : vector<1x768xf32> to vector<8x768xf32>
    %62 = arith.mulf %59, %61 : vector<8x768xf32>
    %c0_80 = arith.constant 0 : index
    %c0_81 = arith.constant 0 : index
    %c0_82 = arith.constant 0 : index
    %63 = vector.load %arg5[%c0_80, %c0_81, %c0_82] : memref<1x8x1xf32, #tpu.memory_space<vmem>>, vector<1x8x1xf32>
    %64 = vector.shape_cast %63 : vector<1x8x1xf32> to vector<8x1xf32>
    %cst_83 = arith.constant dense<0.000000e+00> : vector<8xf32>
    %65 = vector.multi_reduction <add>, %62, %cst_83 [1] : vector<8x768xf32> to vector<8xf32>
    %66 = vector.shape_cast %65 : vector<8xf32> to vector<8x1xf32>
    %67 = arith.addf %64, %66 : vector<8x1xf32>
    %c0_84 = arith.constant 0 : index
    %c0_85 = arith.constant 0 : index
    %c0_86 = arith.constant 0 : index
    %68 = vector.load %arg5[%c0_84, %c0_85, %c0_86] : memref<1x8x1xf32, #tpu.memory_space<vmem>>, vector<1x8x1xf32>
    %69 = vector.shape_cast %68 : vector<1x8x1xf32> to vector<8x1xf32>
    %70 = vector.shape_cast %67 : vector<8x1xf32> to vector<1x8x1xf32>
    tpu.vector_store %arg5[%c0_84, %c0_85, %c0_86], %70 {strides = array<i32>} : memref<1x8x1xf32, #tpu.memory_space<vmem>>, vector<1x8x1xf32>,
    %c0_87 = arith.constant 0 : index
    %c0_88 = arith.constant 0 : index
    %c0_89 = arith.constant 0 : index
    %71 = vector.load %arg6[%c0_87, %c0_88, %c0_89] : memref<1x8x1xf32, #tpu.memory_space<vmem>>, vector<1x8x1xf32>
    %72 = vector.shape_cast %71 : vector<1x8x1xf32> to vector<8x1xf32>
    %73 = arith.mulf %62, %59 : vector<8x768xf32>
    %cst_90 = arith.constant dense<0.000000e+00> : vector<8xf32>
    %74 = vector.multi_reduction <add>, %73, %cst_90 [1] : vector<8x768xf32> to vector<8xf32>
    %75 = vector.shape_cast %74 : vector<8xf32> to vector<8x1xf32>
    %76 = arith.addf %72, %75 : vector<8x1xf32>
    %c0_91 = arith.constant 0 : index
    %c0_92 = arith.constant 0 : index
    %c0_93 = arith.constant 0 : index
    %77 = vector.load %arg6[%c0_91, %c0_92, %c0_93] : memref<1x8x1xf32, #tpu.memory_space<vmem>>, vector<1x8x1xf32>
    %78 = vector.shape_cast %77 : vector<1x8x1xf32> to vector<8x1xf32>
    %79 = vector.shape_cast %76 : vector<8x1xf32> to vector<1x8x1xf32>
    tpu.vector_store %arg6[%c0_91, %c0_92, %c0_93], %79 {strides = array<i32>} : memref<1x8x1xf32, #tpu.memory_space<vmem>>, vector<1x8x1xf32>,
    return
  }
  func.func @transform_0(%arg0: i32, %arg1: i32) -> (i32, i32, i32) {
    %c1_i32 = arith.constant 1 : i32
    %0 = arith.muli %arg0, %c1_i32 : i32
    %1 = arith.addi %0, %arg1 : i32
    %c0_i32 = arith.constant 0 : i32
    %c0_i32_0 = arith.constant 0 : i32
    %c0_i32_1 = arith.constant 0 : i32
    return %1, %c0_i32, %c0_i32_0 : i32, i32, i32
  }
  func.func @transform_1(%arg0: i32, %arg1: i32) -> (i32, i32) {
    %c0_i32 = arith.constant 0 : i32
    %c0_i32_0 = arith.constant 0 : i32
    %c0_i32_1 = arith.constant 0 : i32
    return %c0_i32, %c0_i32_0 : i32, i32
  }
  func.func @transform_2(%arg0: i32, %arg1: i32) -> (i32, i32) {
    %c0_i32 = arith.constant 0 : i32
    %c0_i32_0 = arith.constant 0 : i32
    %c0_i32_1 = arith.constant 0 : i32
    return %c0_i32, %c0_i32_0 : i32, i32
  }
  func.func @transform_3(%arg0: i32, %arg1: i32) -> (i32, i32, i32) {
    %c0_i32 = arith.constant 0 : i32
    %c0_i32_0 = arith.constant 0 : i32
    %c0_i32_1 = arith.constant 0 : i32
    return %arg0, %c0_i32, %c0_i32_0 : i32, i32, i32
  }
  func.func @transform_4(%arg0: i32, %arg1: i32) -> (i32, i32, i32) {
    %c0_i32 = arith.constant 0 : i32
    %c0_i32_0 = arith.constant 0 : i32
    %c0_i32_1 = arith.constant 0 : i32
    return %arg0, %c0_i32, %c0_i32_0 : i32, i32, i32
  }
}

</mosaic_0001>

<bundles_post_ra>
// kernel: tpu_custom_call.1
= control target key start
LH: loop header
LB: loop body
LE: loop exit
PB: predicated region body
PF: predicated region fallthrough
CT: control target
= control target key end

     0   :  { %10 = vsyncpa [#allocation4], 0  ;;  %s1011_s0 = inlined_call_operand.hbm [shape: bf16[2,4,432], index: 0, kind: input, shape index: {}]   ;;  %s1012_s1 = inlined_call_operand.hbm [shape: bf16[8,36], index: 1, kind: input, shape index: {}]   ;;  %s1013_s2 = inlined_call_operand.hbm [shape: f32[1,768], index: 2, kind: input, shape index: {}]   ;;  %s1014_s3 = inlined_call_operand.vmem [shape: f32[1,8,1], index: 3, kind: output, shape index: {0}]   ;;  %s1015_s4 = inlined_call_operand.vmem [shape: f32[1,8,1], index: 4, kind: output, shape index: {1}]  }
   0x1   :  { %11 = vsyncpa [#allocation6], 0  ;;  %s35_s17 = sshll.u32 %s1012_s1, 4  ;;  %s835_s18 = smov [#allocation5]   ;;  %s36_s17 = int_to_ptr.hbm [resolvable:$true] %s35_s17 }
   0x2   :  { %s37_s19 = sshll.u32 %s835_s18, 4  ;;  %s21_s22 = sshll.u32 %s1011_s0, 4  ;;  %s38_s19 = int_to_ptr.vmem [resolvable:$true] %s37_s19  ;;  %s22_s22 = int_to_ptr.hbm [resolvable:$true] %s21_s22 }
   0x3   :  { %40 = dma.hbm_to_vmem [thread:$0]  %s36_s17, 64, %s38_s19, [#allocation6]  }
   0x4   :  { %s836_s23 = smov [#allocation3]   ;;  %s837_s25 = smov 128  }
   0x5   :  { %s23_s24 = sshll.u32 %s836_s23, 4  ;;  %s838_s26 = smov 8   ;;  %s24_s24 = int_to_ptr.vmem [resolvable:$true] %s23_s24 }
   0x6   :  { %29 = dma.hbm_to_vmem [thread:$0]  %s22_s22, 256, %s24_s24, [#allocation4], %s837_s25, %s837_s25, %s838_s26  }
   0x7   :  { %s46_s1 = sshll.u32 %s1013_s2, 4  ;;  %s839_s29 = smov [#allocation7]   ;;  %s47_s1 = int_to_ptr.hbm [resolvable:$true] %s46_s1 }
   0x8   :  { %s48_s30 = sshll.u32 %s839_s29, 4  ;;  %s49_s30 = int_to_ptr.vmem [resolvable:$true] %s48_s30 }
   0x9   :  { %51 = dma.hbm_to_vmem [thread:$0]  %s47_s1, 96, %s49_s30, [#allocation6]  }
   0xa   :  { %831 = dma.done.wait [#allocation4], 256  }
   0xb   :  { %832 = vsyncadd [#allocation4], 4294967040 }
   0xc   :  { %833 = dma.done.wait [#allocation6], 160  }
   0xd   :  { %834 = vsyncadd [#allocation6], 4294967136  ;;  %v74_v0 = vld [vmem:[#allocation3] sm:$0x3f]  ;;  %s840_s0 = smov 127   ;;  %s841_s2 = smov 126  }
   0xe   :  { %76 = vst [vmem:[#allocation1] ss:$2 sm:$0xff] %v74_v0  ;;  %v83_v1 = vld [vmem:[#allocation3] sm:$0xff]  ;;  %s842_s5 = smov 110   ;;  %s843_s6 = smov 109   ;;  %v266_v21 = vld [vmem:[#allocation3 + $0x8] sm:$0xff] }
   0xf   :  { %s844_s7 = smov 108   ;;  %s845_s8 = smov 92   ;;  %v257_v18 = vld [vmem:[#allocation3 + $0x8] sm:$0x3f]  ;;  %vm142_vm0 = vcmask 900096   ;;  %vm99_vm1 = vcmask 1039360  }
  0x10   :  { %s846_s9 = smov 91   ;;  %s847_s10 = smov 90   ;;  %vm97_vm2 = vcmask 1043456   ;;  %vm120_vm3 = vcmask 1031168   ;;  %vm163_vm4 = vcmask 891904   ;;  %vm185_vm5 = vcmask 883712  }
  0x11   :  { %vm228_vm6 = vcmask 744448   ;;  %vm206_vm7 = vcmask 752640   ;;  %vm249_vm8 = vcmask 736256   ;;  %vm525_vm9 = vcmask 1041408  }
  0x12   :  { %vm521_vm10 = vcmask 293888   ;;  %vm71_vm11 = vcmask 7168  }
  0x15   :  { %v77_v2 = vld.sshfl [vmem:[#allocation1] sm:$0xff pattern:$0x75643120]  ;;  %v78_v3 = vld.sshfl [vmem:[#allocation1 + $0x8] sm:$0xff pattern:$0x75643120] }
  0x16   :  { %86 = vst [vmem:[#allocation1 + $0x1] ss:$2 sm:$0xff] %v83_v1 }
  0x17   :  { %81 = vst [vmem:[#allocation2] sm:$0x33] %v77_v2 }
  0x18   :  { %82 = vst [vmem:[#allocation2 + $0x8] sm:$0x3] %v78_v3 }
  0x1d   :  { %v87_v4 = vld.sshfl [vmem:[#allocation1] sm:$0xff pattern:$0x75643120]  ;;  %v89_v5 = vld.sshfl [vmem:[#allocation1 + $0x8] sm:$0xff pattern:$0x75643120] }
  0x1e   :  { %91 = vrot.lane.b32.xlu0 %v87_v4, %s840_s0  ;;  %108 = vst [vmem:[#allocation1] ss:$2 sm:$0xff] %v83_v1  ;;  %93 = vrot.lane.b32.xlu1 %v89_v5, %s840_s0 }
  0x25   :  { %v111_v6 = vld.sshfl [vmem:[#allocation1 + $0x8] sm:$0xff pattern:$0x75643120]  ;;  %v109_v7 = vld.sshfl [vmem:[#allocation1] sm:$0xff pattern:$0x75643120] }
  0x26   :  { %115 = vrot.lane.b32.xlu0 %v111_v6, %s841_s2  ;;  %130 = vst [vmem:[#allocation1 + $0x1] ss:$2 sm:$0xff] %v83_v1  ;;  %113 = vrot.lane.b32.xlu2 %v109_v7, %s841_s2 }
  0x2d   :  { %v131_v8 = vld.sshfl [vmem:[#allocation1] sm:$0xff pattern:$0x75643120]  ;;  %v133_v9 = vld.sshfl [vmem:[#allocation1 + $0x8] sm:$0xff pattern:$0x75643120] }
  0x2e   :  { %151 = vst [vmem:[#allocation1] ss:$2 sm:$0xff] %v83_v1  ;;  %135 = vrot.lane.b32.xlu1 %v131_v8, %s842_s5  ;;  %137 = vrot.lane.b32.xlu2 %v133_v9, %s842_s5 }
  0x35   :  { %v152_v10 = vld.sshfl [vmem:[#allocation1] sm:$0xff pattern:$0x75643120]  ;;  %v154_v11 = vld.sshfl [vmem:[#allocation1 + $0x8] sm:$0xff pattern:$0x75643120] }
  0x36   :  { %173 = vst [vmem:[#allocation1 + $0x1] ss:$2 sm:$0xff] %v83_v1  ;;  %156 = vrot.lane.b32.xlu2 %v152_v10, %s843_s6 }
  0x3d   :  { %v174_v12 = vld.sshfl [vmem:[#allocation1] sm:$0xff pattern:$0x75643120]  ;;  %v176_v13 = vld.sshfl [vmem:[#allocation1 + $0x8] sm:$0xff pattern:$0x75643120] }
  0x3e   :  { %178 = vrot.lane.b32.xlu0 %v174_v12, %s844_s7  ;;  %194 = vst [vmem:[#allocation1] ss:$2 sm:$0xff] %v83_v1  ;;  %180 = vrot.lane.b32.xlu1 %v176_v13, %s844_s7 }
  0x3f   :  { %158 = vrot.lane.b32.xlu2 %v154_v11, %s843_s6 }
  0x45   :  { %v197_v14 = vld.sshfl [vmem:[#allocation1 + $0x8] sm:$0xff pattern:$0x75643120]  ;;  %v195_v15 = vld.sshfl [vmem:[#allocation1] sm:$0xff pattern:$0x75643120] }
  0x46   :  { %201 = vrot.lane.b32.xlu0 %v197_v14, %s845_s8  ;;  %216 = vst [vmem:[#allocation1 + $0x1] ss:$2 sm:$0xff] %v83_v1 }
  0x47   :  { %199 = vrot.lane.b32.xlu2 %v195_v15, %s845_s8 }
  0x4d   :  { %v217_v16 = vld.sshfl [vmem:[#allocation1] sm:$0xff pattern:$0x75643120]  ;;  %v219_v17 = vld.sshfl [vmem:[#allocation1 + $0x8] sm:$0xff pattern:$0x75643120] }
  0x4e   :  { %237 = vst [vmem:[#allocation1] ss:$2 sm:$0xff] %v83_v1  ;;  %221 = vrot.lane.b32.xlu1 %v217_v16, %s846_s9 }
  0x4f   :  { %223 = vrot.lane.b32.xlu2 %v219_v17, %s846_s9 }
  0x55   :  { %v238_v19 = vld.sshfl [vmem:[#allocation1] sm:$0xff pattern:$0x75643120]  ;;  %v240_v20 = vld.sshfl [vmem:[#allocation1 + $0x8] sm:$0xff pattern:$0x75643120] }
  0x56   :  { %242 = vrot.lane.b32.xlu0 %v238_v19, %s847_s10  ;;  %259 = vst [vmem:[#allocation1] ss:$2 sm:$0xff] %v257_v18 }
  0x5d   :  { %v260_v22 = vld.sshfl [vmem:[#allocation1] sm:$0xff pattern:$0x75643120]  ;;  %v261_v23 = vld.sshfl [vmem:[#allocation1 + $0x8] sm:$0xff pattern:$0x75643120] }
  0x5e   :  { %244 = vrot.lane.b32.xlu0 %v240_v20, %s847_s10  ;;  %269 = vst [vmem:[#allocation1 + $0x1] ss:$2 sm:$0xff] %v266_v21 }
  0x5f   :  { %264 = vst [vmem:[#allocation2 + $0xc] sm:$0x33] %v260_v22 }
  0x60   :  { %265 = vst [vmem:[#allocation2 + $0x14] sm:$0x3] %v261_v23 }
  0x65   :  { %v270_v24 = vld.sshfl [vmem:[#allocation1] sm:$0xff pattern:$0x75643120]  ;;  %v272_v25 = vld.sshfl [vmem:[#allocation1 + $0x8] sm:$0xff pattern:$0x75643120] }
  0x66   :  { %276 = vrot.lane.b32.xlu0 %v272_v25, %s840_s0  ;;  %289 = vst [vmem:[#allocation1] ss:$2 sm:$0xff] %v266_v21  ;;  %274 = vrot.lane.b32.xlu2 %v270_v24, %s840_s0 }
  0x6d   :  { %v901_v26 = vld.sshfl [vmem:[#allocation1] sm:$0xff pattern:$0x75643120]  ;;  %v292_v27 = vld.sshfl [vmem:[#allocation1 + $0x8] sm:$0xff pattern:$0x75643120] }
  0x6e   :  { %310 = vst [vmem:[#allocation1 + $0x1] ss:$2 sm:$0xff] %v266_v21 }
  0x75   :  { %v311_v28 = vld.sshfl [vmem:[#allocation1] sm:$0xff pattern:$0x75643120]  ;;  %v903_v29 = vld.sshfl [vmem:[#allocation1 + $0x8] sm:$0xff pattern:$0x75643120] }
  0x76   :  { %330 = vst [vmem:[#allocation1] ss:$2 sm:$0xff] %v266_v21 }
  0x7d   :  { %v331_v30 = vld.sshfl [vmem:[#allocation1] sm:$0xff pattern:$0x75643120]  ;;  %v333_v31 = vld.sshfl [vmem:[#allocation1 + $0x8] sm:$0xff pattern:$0x75643120] }
  0x7e   :  { %335 = vrot.lane.b32.xlu0 %v331_v30, %s843_s6  ;;  %337 = vrot.lane.b32.xlu1 %v333_v31, %s843_s6  ;;  %351 = vst [vmem:[#allocation1 + $0x1] ss:$2 sm:$0xff] %v266_v21 }
  0x80   :  { %v114_v36 = vpop.permute.xlu2 %113 }
  0x81   :  { %v117_v43 = vrot.slane %v114_v36, 4 }
  0x85   :  { %v354_v32 = vld.sshfl [vmem:[#allocation1 + $0x8] sm:$0xff pattern:$0x75643120]  ;;  %v352_v33 = vld.sshfl [vmem:[#allocation1] sm:$0xff pattern:$0x75643120] }
  0x86   :  { %358 = vrot.lane.b32.xlu0 %v354_v32, %s844_s7  ;;  %371 = vst [vmem:[#allocation1] ss:$2 sm:$0xff] %v266_v21  ;;  %356 = vrot.lane.b32.xlu2 %v352_v33, %s844_s7 }
  0x88   :  { %v138_v41 = vpop.permute.xlu2 %137 }
  0x89   :  { %v140_v44 = vrot.slane %v138_v41, 4 }
  0x8b   :  { %v144_v48 = vsel %vm142_vm0, %v138_v41, %v140_v44 }
  0x8c   :  { %148 = vst [vmem:[#allocation2 + $0x20] sm:$0xc] %v144_v48 }
  0x8d   :  { %v372_v34 = vld.sshfl [vmem:[#allocation1] sm:$0xff pattern:$0x75643120]  ;;  %v374_v35 = vld.sshfl [vmem:[#allocation1 + $0x8] sm:$0xff pattern:$0x75643120] }
  0x8e   :  { %376 = vrot.lane.b32.xlu1 %v372_v34, %s845_s8  ;;  %392 = vst [vmem:[#allocation1 + $0x1] ss:$2 sm:$0xff] %v266_v21  ;;  %378 = vrot.lane.b32.xlu2 %v374_v35, %s845_s8 }
  0x90   :  { %v92_v37 = vpop.permute.xlu0 %91  ;;  %v94_v42 = vpop.permute.xlu1 %93 }
  0x91   :  { %v95_v38 = vrot.slane %v92_v37, 4  ;;  %v96_v45 = vrot.slane %v94_v42, 4  ;;  %v157_v56 = vpop.permute.xlu2 %156 }
  0x92   :  { %v160_v62 = vrot.slane %v157_v56, 4 }
  0x93   :  { %v98_v49 = vsel %vm97_vm2, %v95_v38, %v96_v45  ;;  %v101_v54 = vsel %vm99_vm1, %v94_v42, %v96_v45 }
  0x94   :  { %v100_v50 = vsel %vm99_vm1, %v92_v37, %v98_v49  ;;  %105 = vst [vmem:[#allocation2 + $0x8] sm:$0xc] %v101_v54 }
  0x95   :  { %v395_v39 = vld.sshfl [vmem:[#allocation1 + $0x8] sm:$0xff pattern:$0x75643120]  ;;  %v393_v40 = vld.sshfl [vmem:[#allocation1] sm:$0xff pattern:$0x75643120] }
  0x96   :  { %399 = vrot.lane.b32.xlu1 %v395_v39, %s846_s9  ;;  %397 = vrot.lane.b32.xlu0 %v393_v40, %s846_s9  ;;  %412 = vst [vmem:[#allocation1] ss:$2 sm:$0xff] %v266_v21 }
  0x97   :  { %296 = vrot.lane.b32.xlu2 %v292_v27, %s841_s2  ;;  %104 = vst [vmem:[#allocation2] sm:$0xcc] %v100_v50 }
  0x98   :  { %v116_v46 = vpop.permute.xlu0 %115 }
  0x99   :  { %v118_v47 = vrot.slane %v116_v46, 4  ;;  %v159_v63 = vpop.permute.xlu2 %158 }
  0x9a   :  { %v161_v0 = vrot.slane %v159_v63, 4 }
  0x9b   :  { %v119_v51 = vsel %vm97_vm2, %v117_v43, %v118_v47  ;;  %v122_v52 = vsel %vm120_vm3, %v116_v46, %v118_v47 }
  0x9c   :  { %v121_v53 = vsel %vm120_vm3, %v114_v36, %v119_v51  ;;  %126 = vst [vmem:[#allocation2 + $0x20] sm:$0x3] %v122_v52  ;;  %v162_v1 = vsel %vm97_vm2, %v160_v62, %v161_v0  ;;  %v165_v2 = vsel %vm163_vm4, %v159_v63, %v161_v0 }
  0x9d   :  { %v413_v55 = vld.sshfl [vmem:[#allocation1] sm:$0xff pattern:$0x75643120]  ;;  %125 = vst [vmem:[#allocation2 + $0x18] sm:$0x33] %v121_v53  ;;  %v164_v3 = vsel %vm163_vm4, %v157_v56, %v162_v1 }
  0x9e   :  { %417 = vrot.lane.b32.xlu1 %v413_v55, %s847_s10  ;;  %315 = vrot.lane.b32.xlu0 %v311_v28, %s842_s5  ;;  %v415_v59 = vld.sshfl [vmem:[#allocation1 + $0x8] sm:$0xff pattern:$0x75643120]  ;;  %169 = vst [vmem:[#allocation2 + $0x38] sm:$0x3] %v165_v2 }
  0x9f   :  { %168 = vst [vmem:[#allocation2 + $0x30] sm:$0x33] %v164_v3  ;;  %v681_v53 = vld [vmem:[#allocation2] sm:$0xf]  ;;  %v733_v55 = vld [vmem:[#allocation2 + $0x4] sm:$0xf] }
  0xa0   :  { %v136_v57 = vpop.permute.xlu1 %135 }
  0xa1   :  { %v139_v58 = vrot.slane %v136_v57, 4  ;;  %v200_v4 = vpop.permute.xlu2 %199 }
  0xa2   :  { %v203_v13 = vrot.slane %v200_v4, 4 }
  0xa3   :  { %v141_v60 = vsel %vm97_vm2, %v139_v58, %v140_v44 }
  0xa4   :  { %v143_v61 = vsel %vm142_vm0, %v136_v57, %v141_v60 }
  0xa5   :  { %147 = vst [vmem:[#allocation2 + $0x18] sm:$0xcc] %v143_v61 }
  0xa6   :  { %419 = vrot.lane.b32.xlu1 %v415_v59, %s847_s10 }
  0xa9   :  { %v224_v12 = vpop.permute.xlu2 %223 }
  0xaa   :  { %v226_v14 = vrot.slane %v224_v12, 4 }
  0xac   :  { %v230_v17 = vsel %vm228_vm6, %v224_v12, %v226_v14  ;;  %v736_v54 = vld [vmem:[#allocation2 + $0x14] sm:$0xf0]  ;;  %v683_v56 = vld [vmem:[#allocation2 + $0x18] sm:$0xf0] }
  0xad   :  { %234 = vst [vmem:[#allocation2 + $0x50] sm:$0xc] %v230_v17  ;;  %v682_v57 = vor.u32 %v736_v54, %v681_v53  ;;  %v686_v58 = vor.u32 %v733_v55, %v683_v56 }
  0xae   :  { %294 = vrot.lane.b32.xlu1 %v901_v26, %s841_s2 }
  0xb0   :  { %v179_v5 = vpop.permute.xlu0 %178  ;;  %v181_v6 = vpop.permute.xlu1 %180 }
  0xb1   :  { %v182_v7 = vrot.slane %v179_v5, 4  ;;  %v183_v8 = vrot.slane %v181_v6, 4 }
  0xb3   :  { %v184_v9 = vsel %vm97_vm2, %v182_v7, %v183_v8  ;;  %v187_v10 = vsel %vm185_vm5, %v181_v6, %v183_v8 }
  0xb4   :  { %v186_v11 = vsel %vm185_vm5, %v179_v5, %v184_v9  ;;  %191 = vst [vmem:[#allocation2 + $0x38] sm:$0xc] %v187_v10 }
  0xb5   :  { %190 = vst [vmem:[#allocation2 + $0x30] sm:$0xcc] %v186_v11 }
  0xb6   :  { %317 = vrot.lane.b32.xlu1 %v903_v29, %s842_s5 }
  0xb8   :  { %v202_v15 = vpop.permute.xlu0 %201 }
  0xb9   :  { %v204_v16 = vrot.slane %v202_v15, 4 }
  0xbb   :  { %v208_v18 = vsel %vm206_vm7, %v202_v15, %v204_v16  ;;  %v205_v19 = vsel %vm97_vm2, %v203_v13, %v204_v16 }
  0xbc   :  { %212 = vst [vmem:[#allocation2 + $0x50] sm:$0x3] %v208_v18  ;;  %v207_v20 = vsel %vm206_vm7, %v200_v4, %v205_v19  ;;  %v705_v42 = vld [vmem:[#allocation2 + $0x30] sm:$0xf]  ;;  %v739_v46 = vld [vmem:[#allocation2 + $0x34] sm:$0xf] }
  0xbd   :  { %211 = vst [vmem:[#allocation2 + $0x48] sm:$0x33] %v207_v20 }
  0xc0   :  { %v222_v21 = vpop.permute.xlu1 %221  ;;  %v275_v32 = vpop.permute.xlu2 %274 }
  0xc1   :  { %v225_v22 = vrot.slane %v222_v21, 4  ;;  %v278_v33 = vrot.slane %v275_v32, 4 }
  0xc3   :  { %v227_v23 = vsel %vm97_vm2, %v225_v22, %v226_v14  ;;  %v960_v22 = vld [vmem:[#allocation5] sm:$0xf] }
  0xc4   :  { %v229_v24 = vsel %vm228_vm6, %v222_v21, %v227_v23 }
  0xc5   :  { %233 = vst [vmem:[#allocation2 + $0x48] sm:$0xcc] %v229_v24 }
  0xc8   :  { %v243_v25 = vpop.permute.xlu0 %242 }
  0xc9   :  { %v246_v26 = vrot.slane %v243_v25, 4 }
  0xcc   :  { %v742_v45 = vld [vmem:[#allocation2 + $0x44] sm:$0xf0]  ;;  %v707_v47 = vld [vmem:[#allocation2 + $0x48] sm:$0xf0] }
  0xcd   :  { %v706_v51 = vor.u32 %v742_v45, %v705_v42  ;;  %v710_v52 = vor.u32 %v739_v46, %v707_v47 }
  0xd0   :  { %v245_v27 = vpop.permute.xlu0 %244 }
  0xd1   :  { %v247_v28 = vrot.slane %v245_v27, 4 }
  0xd3   :  { %v248_v29 = vsel %vm97_vm2, %v246_v26, %v247_v28  ;;  %v251_v30 = vsel %vm249_vm8, %v245_v27, %v247_v28 }
  0xd4   :  { %v250_v31 = vsel %vm249_vm8, %v243_v25, %v248_v29  ;;  %255 = vst [vmem:[#allocation2 + $0x68] sm:$0x3] %v251_v30 }
  0xd5   :  { %254 = vst [vmem:[#allocation2 + $0x60] sm:$0x33] %v250_v31 }
  0xd8   :  { %v277_v34 = vpop.permute.xlu0 %276 }
  0xd9   :  { %v279_v35 = vrot.slane %v277_v34, 4 }
  0xdb   :  { %v282_v36 = vsel %vm99_vm1, %v277_v34, %v279_v35  ;;  %v280_v37 = vsel %vm97_vm2, %v278_v33, %v279_v35 }
  0xdc   :  { %v443_v38 = vld [vmem:[#allocation2 + $0x60] sm:$0x33]  ;;  %286 = vst [vmem:[#allocation2 + $0x14] sm:$0xc] %v282_v36  ;;  %v281_v39 = vsel %vm99_vm1, %v275_v32, %v280_v37 }
  0xdd   :  { %v485_v40 = vunpack.c.l.b16 %v443_v38  ;;  %v486_v41 = vunpack.c.h.b16 %v443_v38  ;;  %285 = vst [vmem:[#allocation2 + $0xc] sm:$0xcc] %v281_v39 }
  0xdf   :  { %v503_v43 = vpack.c.b16 %v485_v40, %v485_v40  ;;  %v504_v44 = vpack.c.b16 %v486_v41, %v486_v41 }
  0xe0   :  { %v357_v48 = vpop.permute.xlu2 %356 }
  0xe1   :  { %v527_v49 = vsel %vm525_vm9, %v503_v43, 0  ;;  %v530_v50 = vsel %vm525_vm9, %v504_v44, 0  ;;  %v360_v5 = vrot.slane %v357_v48, 4 }
  0xe2   :  { %549 = vmatpush.bf16.msra.mxu0 %v527_v49  ;;  %562 = vmatpush.bf16.msra.mxu1 %v530_v50  ;;  %v713_v50 = vld [vmem:[#allocation2 + $0x38] sm:$0xf] }
  0xe6   :  { %550 = vmatpush.bf16.msra.mxu0 %v706_v51  ;;  %563 = vmatpush.bf16.msra.mxu1 %v710_v52  ;;  %v743_v51 = vld [vmem:[#allocation2 + $0x4c] sm:$0xf0] }
  0xe8   :  { %v379_v59 = vpop.permute.xlu2 %378 }
  0xe9   :  { %v381_v60 = vrot.slane %v379_v59, 4 }
  0xea   :  { %551 = vmatpush.bf16.msra.mxu0 %v682_v57  ;;  %564 = vmatpush.bf16.msra.mxu1 %v686_v58 }
  0xeb   :  { %v384_v61 = vsel %vm206_vm7, %v379_v59, %v381_v60 }
  0xec   :  { %388 = vst [vmem:[#allocation2 + $0x5c] sm:$0x3] %v384_v61 }
  0xed   :  { %727 = vmatmul.msk.bf16.vlgmr.msra.gmra.mxu0 %vm521_vm10, %v960_v22  ;;  %728 = vmatmul.msk.bf16.vlgmr.msra.gmra.mxu1 %vm521_vm10, %v960_v22 }
  0xf0   :  { %v336_v62 = vpop.permute.xlu0 %335  ;;  %v338_v63 = vpop.permute.xlu1 %337 }
  0xf1   :  { %v339_v0 = vrot.slane %v336_v62, 4  ;;  %v340_v1 = vrot.slane %v338_v63, 4  ;;  %v297_v11 = vpop.permute.xlu2 %296 }
  0xf2   :  { %v299_v12 = vrot.slane %v297_v11, 4 }
  0xf3   :  { %v341_v2 = vsel %vm97_vm2, %v339_v0, %v340_v1  ;;  %v343_v3 = vsel %vm163_vm4, %v338_v63, %v340_v1  ;;  %v714_v0 = vor.u32 %v743_v51, %v713_v50 }
  0xf4   :  { %v342_v4 = vsel %vm163_vm4, %v336_v62, %v341_v2  ;;  %347 = vst [vmem:[#allocation2 + $0x44] sm:$0x3] %v343_v3  ;;  %v302_v14 = vsel %vm120_vm3, %v297_v11, %v299_v12  ;;  %v734_v11 = vld [vmem:[#allocation2 + $0xc] sm:$0xf] }
  0xf5   :  { %346 = vst [vmem:[#allocation2 + $0x3c] sm:$0x33] %v342_v4 }
  0xf6   :  { %306 = vst [vmem:[#allocation2 + $0x2c] sm:$0x3] %v302_v14  ;;  %v697_v14 = vld [vmem:[#allocation2 + $0x10] sm:$0xf] }
  0xf8   :  { %v359_v6 = vpop.permute.xlu0 %358 }
  0xf9   :  { %v361_v7 = vrot.slane %v359_v6, 4 }
  0xfb   :  { %v364_v8 = vsel %vm185_vm5, %v359_v6, %v361_v7  ;;  %v362_v9 = vsel %vm97_vm2, %v360_v5, %v361_v7  ;;  %v689_v6 = vld [vmem:[#allocation2 + $0x8] sm:$0xf]  ;;  %v737_v7 = vld [vmem:[#allocation2 + $0x1c] sm:$0xf0] }
  0xfc   :  { %368 = vst [vmem:[#allocation2 + $0x44] sm:$0xc] %v364_v8  ;;  %v363_v10 = vsel %vm185_vm5, %v357_v48, %v362_v9  ;;  %v690_v8 = vor.u32 %v737_v7, %v689_v6  ;;  %v735_v9 = vld [vmem:[#allocation2 + $0x14] sm:$0xf] }
  0xfd   :  { %367 = vst [vmem:[#allocation2 + $0x3c] sm:$0xcc] %v363_v10 }
 0x100   :  { %v377_v13 = vpop.permute.xlu1 %376 }
 0x101   :  { %v380_v15 = vrot.slane %v377_v13, 4 }
 0x103   :  { %v382_v16 = vsel %vm97_vm2, %v380_v15, %v381_v60  ;;  %v741_v3 = vld [vmem:[#allocation2 + $0x44] sm:$0xf] }
 0x104   :  { %v383_v17 = vsel %vm206_vm7, %v377_v13, %v382_v16  ;;  %v740_v62 = vld [vmem:[#allocation2 + $0x3c] sm:$0xf]  ;;  %v721_v2 = vld [vmem:[#allocation2 + $0x40] sm:$0xf] }
 0x105   :  { %387 = vst [vmem:[#allocation2 + $0x54] sm:$0x33] %v383_v17 }
 0x108   :  { %v400_v18 = vpop.permute.xlu1 %399  ;;  %v398_v19 = vpop.permute.xlu0 %397 }
 0x109   :  { %v402_v20 = vrot.slane %v400_v18, 4  ;;  %v401_v21 = vrot.slane %v398_v19, 4 }
 0x10b   :  { %v405_v23 = vsel %vm228_vm6, %v400_v18, %v402_v20  ;;  %v403_v24 = vsel %vm97_vm2, %v401_v21, %v402_v20 }
 0x10c   :  { %409 = vst [vmem:[#allocation2 + $0x5c] sm:$0xc] %v405_v23  ;;  %v404_v25 = vsel %vm228_vm6, %v398_v19, %v403_v24  ;;  %v848_v23 = vmov 0.0   ;;  %v622_v24 = vld [vmem:[#allocation7] sm:$0x3f] }
 0x10d   :  { %408 = vst [vmem:[#allocation2 + $0x54] sm:$0xcc] %v404_v25  ;;  %v624_v25 = vperm.slane %v622_v24, 0 }
 0x10e   :  { %72 = vst.msk [vmem:[%s1014_s3] sm:$0xff] %vm71_vm11, %v848_v23 }
 0x10f   :  { %73 = vst.msk [vmem:[%s1015_s4] sm:$0xff] %vm71_vm11, %v848_v23 }
 0x110   :  { %v418_v26 = vpop.permute.xlu1 %417  ;;  %v316_v36 = vpop.permute.xlu0 %315 }
 0x111   :  { %v421_v28 = vrot.slane %v418_v26, 4  ;;  %v319_v44 = vrot.slane %v316_v36, 4 }
 0x113   :  { %v723_v59 = vld [vmem:[#allocation2 + $0x58] sm:$0xf0] }
 0x114   :  { %v715_v56 = vld [vmem:[#allocation2 + $0x50] sm:$0xf0]  ;;  %v744_v58 = vld [vmem:[#allocation2 + $0x54] sm:$0xf0]  ;;  %v726_v5 = vor.u32 %v741_v3, %v723_v59 }
 0x115   :  { %v718_v1 = vor.u32 %v740_v62, %v715_v56  ;;  %v722_v4 = vor.u32 %v744_v58, %v721_v2 }
 0x116   :  { %v653_v62 = vld [vmem:[%s1015_s4] sm:$0xff] }
 0x118   :  { %v420_v27 = vpop.permute.xlu1 %419 }
 0x119   :  { %v422_v29 = vrot.slane %v420_v27, 4 }
 0x11b   :  { %v423_v30 = vsel %vm97_vm2, %v421_v28, %v422_v29  ;;  %v425_v31 = vsel %vm249_vm8, %v420_v27, %v422_v29 }
 0x11c   :  { %v424_v32 = vsel %vm249_vm8, %v418_v26, %v423_v30  ;;  %429 = vst [vmem:[#allocation2 + $0x74] sm:$0x3] %v425_v31  ;;  %v625_v26 = vperm.slane %v622_v24, 1 }
 0x11d   :  { %428 = vst [vmem:[#allocation2 + $0x6c] sm:$0x33] %v424_v32 }
 0x120   :  { %v295_v33 = vpop.permute.xlu1 %294 }
 0x121   :  { %v298_v34 = vrot.slane %v295_v33, 4 }
 0x123   :  { %v300_v35 = vsel %vm97_vm2, %v298_v34, %v299_v12 }
 0x124   :  { %v301_v37 = vsel %vm120_vm3, %v295_v33, %v300_v35  ;;  %v444_v38 = vld [vmem:[#allocation2 + $0x68] sm:$0x33]  ;;  %v445_v39 = vld [vmem:[#allocation2 + $0x70] sm:$0x33]  ;;  %v628_v35 = vperm.slane %v622_v24, 4 }
 0x125   :  { %305 = vst [vmem:[#allocation2 + $0x24] sm:$0x33] %v301_v37  ;;  %v487_v40 = vunpack.c.l.b16 %v444_v38  ;;  %v488_v41 = vunpack.c.h.b16 %v444_v38  ;;  %v489_v42 = vunpack.c.l.b16 %v445_v39  ;;  %v490_v43 = vunpack.c.h.b16 %v445_v39 }
 0x126   :  { %v629_v39 = vperm.slane %v622_v24, 5 }
 0x127   :  { %v505_v45 = vpack.c.b16 %v487_v40, %v487_v40  ;;  %v506_v46 = vpack.c.b16 %v488_v41, %v488_v41  ;;  %v507_v47 = vpack.c.b16 %v489_v42, %v489_v42  ;;  %v508_v48 = vpack.c.b16 %v490_v43, %v490_v43 }
 0x128   :  { %v318_v49 = vpop.permute.xlu1 %317 }
 0x129   :  { %v320_v52 = vrot.slane %v318_v49, 4  ;;  %v533_v53 = vsel %vm525_vm9, %v505_v45, 0  ;;  %v536_v54 = vsel %vm525_vm9, %v506_v46, 0  ;;  %v539_v55 = vsel %vm525_vm9, %v507_v47, 0 }
 0x12a   :  { %575 = vmatpush.bf16.msra.mxu2 %v533_v53  ;;  %588 = vmatpush.bf16.msra.mxu3 %v536_v54  ;;  %v542_v57 = vsel %vm525_vm9, %v508_v48, 0 }
 0x12b   :  { %v321_v60 = vsel %vm97_vm2, %v319_v44, %v320_v52  ;;  %v323_v61 = vsel %vm142_vm0, %v318_v49, %v320_v52  ;;  %601 = vmatpush.bf16.msrb.mxu0 %v539_v55  ;;  %614 = vmatpush.bf16.msrb.mxu1 %v542_v57 }
 0x12c   :  { %v322_v63 = vsel %vm142_vm0, %v316_v36, %v321_v60  ;;  %327 = vst [vmem:[#allocation2 + $0x2c] sm:$0xc] %v323_v61  ;;  %v627_v36 = vperm.slane %v622_v24, 3  ;;  %v642_v60 = vld [vmem:[%s1014_s3] sm:$0xff] }
 0x12d   :  { %326 = vst [vmem:[#allocation2 + $0x24] sm:$0xcc] %v322_v63 }
 0x12e   :  { %576 = vmatpush.bf16.msra.mxu2 %v714_v0  ;;  %589 = vmatpush.bf16.msra.mxu3 %v718_v1 }
 0x12f   :  { %602 = vmatpush.bf16.msrb.mxu0 %v722_v4  ;;  %615 = vmatpush.bf16.msrb.mxu1 %v726_v5 }
 0x132   :  { %577 = vmatpush.bf16.msra.mxu2 %v690_v8 }
 0x133   :  { %v699_v10 = vld [vmem:[#allocation2 + $0x28] sm:$0xf0] }
 0x134   :  { %v702_v12 = vor.u32 %v735_v9, %v699_v10  ;;  %v691_v13 = vld [vmem:[#allocation2 + $0x20] sm:$0xf0]  ;;  %v738_v15 = vld [vmem:[#allocation2 + $0x24] sm:$0xf0] }
 0x135   :  { %729 = vmatmul.msk.bf16.vlgmr.msra.gmra.mxu2 %vm521_vm10, %v960_v22  ;;  %v694_v16 = vor.u32 %v734_v11, %v691_v13  ;;  %v698_v17 = vor.u32 %v738_v15, %v697_v14 }
 0x136   :  { %616 = vmatpush.bf16.msrb.mxu1 %v702_v12 }
 0x137   :  { %590 = vmatpush.bf16.msra.mxu3 %v694_v16  ;;  %603 = vmatpush.bf16.msrb.mxu0 %v698_v17 }
 0x139   :  { %732 = vmatmul.msk.bf16.vlgmr.msrb.gmra.mxu1 %vm521_vm10, %v960_v22 }
 0x13a   :  { %730 = vmatmul.msk.bf16.vlgmr.msra.gmra.mxu3 %vm521_vm10, %v960_v22  ;;  %731 = vmatmul.msk.bf16.vlgmr.msrb.gmra.mxu0 %vm521_vm10, %v960_v22  ;;  %v626_v22 = vperm.slane %v622_v24, 2 }
 0x16a   :  { %v553_v18 = vpop.f32.mrf.mxu0  ;;  %v566_v19 = vpop.f32.mrf.mxu1 }
 0x16b   :  { %v636_v27 = vmul.f32 %v624_v25, %v553_v18  ;;  %v637_v28 = vmul.f32 %v625_v26, %v566_v19 }
 0x16d   :  { %v654_v33 = vmul.f32 %v636_v27, %v553_v18  ;;  %v655_v34 = vmul.f32 %v637_v28, %v566_v19  ;;  %v643_v37 = vadd.f32 %v637_v28, %v636_v27 }
 0x16f   :  { %v660_v41 = vadd.f32 %v655_v34, %v654_v33 }
 0x172   :  { %v555_v20 = vpop.f32.mrf.mxu0  ;;  %v568_v21 = vpop.f32.mrf.mxu1 }
 0x1b6   :  { %v618_v29 = vpop.f32.mrf.mxu1 }
 0x1b7   :  { %v605_v30 = vpop.f32.mrf.mxu0  ;;  %v641_v48 = vmul.f32 %v629_v39, %v618_v29 }
 0x1b8   :  { %v579_v31 = vpop.f32.mrf.mxu2  ;;  %v640_v42 = vmul.f32 %v628_v35, %v605_v30 }
 0x1b9   :  { %v638_v32 = vmul.f32 %v626_v22, %v579_v31  ;;  %v659_v55 = vmul.f32 %v641_v48, %v618_v29 }
 0x1ba   :  { %v658_v52 = vmul.f32 %v640_v42, %v605_v30 }
 0x1bb   :  { %v656_v38 = vmul.f32 %v638_v32, %v579_v31  ;;  %v644_v43 = vadd.f32 %v643_v37, %v638_v32 }
 0x1bd   :  { %v592_v40 = vpop.f32.mrf.mxu3  ;;  %v661_v47 = vadd.f32 %v660_v41, %v656_v38 }
 0x1be   :  { %v639_v44 = vmul.f32 %v627_v36, %v592_v40  ;;  %v620_v45 = vpop.f32.mrf.mxu1 }
 0x1bf   :  { %v607_v46 = vpop.f32.mrf.mxu0 }
 0x1c0   :  { %v645_v49 = vadd.f32 %v644_v43, %v639_v44  ;;  %v657_v50 = vmul.f32 %v639_v44, %v592_v40  ;;  %v581_v51 = vpop.f32.mrf.mxu2 }
 0x1c2   :  { %v662_v53 = vadd.f32 %v661_v47, %v657_v50  ;;  %v646_v54 = vadd.f32 %v645_v49, %v640_v42 }
 0x1c4   :  { %v647_v56 = vadd.f32 %v646_v54, %v641_v48  ;;  %v663_v57 = vadd.f32 %v662_v53, %v658_v52 }
 0x1c5   :  { %v594_v58 = vpop.f32.mrf.mxu3 }
 0x1c6   :  { %648 = vadd.xlane.f32.xlu2 %v647_v56  ;;  %v664_v59 = vadd.f32 %v663_v57, %v659_v55 }
 0x1c8   :  { %665 = vadd.xlane.f32.xlu0 %v664_v59 }
 0x239   :  { %v649_v61 = vpop.xlane.xlu2 %648 }
 0x23a   :  { %v650_v63 = vadd.f32 %v649_v61, %v642_v60 }
 0x23b   :  { %v666_v0 = vpop.xlane.xlu0 %665 }
 0x23c   :  { %652 = vst.msk [vmem:[%s1014_s3] sm:$0xff] %vm71_vm11, %v650_v63  ;;  %v667_v1 = vadd.f32 %v666_v0, %v653_v62 }
 0x23e   :  { %668 = vst.msk [vmem:[%s1015_s4] sm:$0xff] %vm71_vm11, %v667_v1 }
 0x23f   :  { %677 = vsyncpa [#allocation4], 1 }
 0x240   :  { %678 = vsyncpa [#allocation6], 1 }

</bundles_post_ra>
